<compile_context>
chip_gen: v7x
topology: tpu7x:2x2x1
jax: 0.10.0
libtpu: 0.0.40
codegen_flags: <defaults>
</compile_context>

<pallas_src>
import math

import jax
import jax.numpy as jnp
from jax.experimental import pallas as pl
from jax.experimental.pallas import tpu as pltpu

IN_FEATURES = 7 * 4 * 4   # 112
H1 = 4 * 4 * 4            # 64
H2 = 16
H1_PAD = 128              # lane-padded hidden sizes
H2_PAD = 128


def _round_up(n, m):
    return ((n + m - 1) // m) * m


def mlp_kernel(x_ref, w1_ref, b1_ref, w2_ref, b2_ref, w3_ref, b3_ref, o_ref):
    # x_ref: (TM, 112) f32 tile (streamed per grid step); weights are VMEM-resident.
    x = x_ref[...]

    h1 = jnp.dot(x, w1_ref[...], preferred_element_type=jnp.float32) + b1_ref[...]
    h1 = jax.nn.sigmoid(h1)                                   # (TM, 128), cols >=64 inert

    h2 = jnp.dot(h1, w2_ref[...], preferred_element_type=jnp.float32) + b2_ref[...]
    h2 = jax.nn.sigmoid(h2)                                   # (TM, 128), cols >=16 inert

    # Final layer transposed so the store is lane-dense (1, TM), not masked (TM, 1).
    h2_t = h2.T                                               # (128, TM) -- XLU, idle slot
    h3_t = jnp.dot(w3_ref[...], h2_t, preferred_element_type=jnp.float32) + b3_ref[...]
    o_ref[...] = jax.nn.sigmoid(h3_t).astype(o_ref.dtype)     # (1, TM)


def _pad_params(params):
    """Zero-pad feature dims to 128 lanes; padded columns/rows cannot affect the output."""
    w1, b1, w2, b2, w3, b3 = params
    w1p = jnp.pad(w1, ((0, 0), (0, H1_PAD - H1)))             # (112, 128)
    b1p = jnp.pad(b1, ((0, 0), (0, H1_PAD - H1)))             # (1, 128)
    w2p = jnp.pad(w2, ((0, H1_PAD - H1), (0, H2_PAD - H2)))   # (128, 128), extra rows = 0
    b2p = jnp.pad(b2, ((0, 0), (0, H2_PAD - H2)))             # (1, 128)
    w3p = jnp.pad(w3, ((0, 0), (0, H2_PAD - H2)))             # (1, 128), extra cols = 0
    return w1p, b1p, w2p, b2p, w3p, b3


def cnn_model_forward(x_nchw, params, *, tm=512):
    """Forward pass of CNN_Model. x_nchw: [B, 7, 4, 4] f32 -> [B, 1] f32."""
    B = x_nchw.shape[0]
    x = x_nchw.reshape(B, IN_FEATURES)          # matches torch .view(-1, 7*4*4)

    # Batch tile: multiple of 128 (lane-aligned output row), capped at `tm` rows.
    TM = min(_round_up(B, 128), _round_up(tm, 128))
    B_pad = _round_up(B, TM)
    if B_pad != B:
        x = jnp.pad(x, ((0, B_pad - B), (0, 0)))

    w1p, b1p, w2p, b2p, w3p, b3 = _pad_params(params)
    grid = (B_pad // TM,)

    out_t = pl.pallas_call(
        mlp_kernel,
        out_shape=jax.ShapeDtypeStruct((1, B_pad), jnp.float32),
        grid=grid,
        in_specs=[
            pl.BlockSpec((TM, IN_FEATURES), lambda i: (i, 0)),       # x: streamed
            pl.BlockSpec(w1p.shape, lambda i: (0, 0)),               # weights: resident
            pl.BlockSpec(b1p.shape, lambda i: (0, 0)),
            pl.BlockSpec(w2p.shape, lambda i: (0, 0)),
            pl.BlockSpec(b2p.shape, lambda i: (0, 0)),
            pl.BlockSpec(w3p.shape, lambda i: (0, 0)),
            pl.BlockSpec(b3.shape, lambda i: (0, 0)),
        ],
        out_specs=pl.BlockSpec((1, TM), lambda i: (0, i)),           # lane-dense writeback
        compiler_params=pltpu.CompilerParams(
            dimension_semantics=("parallel",),                       # megacore on v7x
        ),
    )(x, w1p, b1p, w2p, b2p, w3p, b3)

    return out_t[0, :B].reshape(B, 1)


def xavier_uniform(key, fan_in, fan_out, shape, gain=1.0):
    # torch.nn.init.xavier_uniform_ ; calculate_gain('sigmoid') == 1.0
    limit = gain * math.sqrt(6.0 / (fan_in + fan_out))
    return jax.random.uniform(key, shape, jnp.float32, -limit, limit)


def linear_bias(key, fan_in, fan_out):
    # torch.nn.Linear default bias init: U(-1/sqrt(fan_in), 1/sqrt(fan_in))
    bound = 1.0 / math.sqrt(fan_in)
    return jax.random.uniform(key, (1, fan_out), jnp.float32, -bound, bound)


def init_params(key):
    k1, k2, k3, k4, k5, k6 = jax.random.split(key, 6)
    gain = 1.0
    w1 = xavier_uniform(k1, IN_FEATURES, H1, (IN_FEATURES, H1), gain)   # [in, out]
    b1 = linear_bias(k2, IN_FEATURES, H1)
    w2 = xavier_uniform(k3, H1, H2, (H1, H2), gain)                     # [in, out]
    b2 = linear_bias(k4, H1, H2)
    w3 = xavier_uniform(k5, H2, 1, (1, H2), gain)                       # torch layout [out, in]
    b3 = linear_bias(k6, H2, 1)                                         # (1, 1)
    return (w1, b1, w2, b2, w3, b3)


def forward_ref(x_nchw, params):
    # Pure-JAX reference for correctness checking.
    w1, b1, w2, b2, w3, b3 = params
    x = x_nchw.reshape(x_nchw.shape[0], -1)
    h = jax.nn.sigmoid(x @ w1 + b1)
    h = jax.nn.sigmoid(h @ w2 + b2)
    return jax.nn.sigmoid(h @ w3.T + b3)


# TODO(synk): SGD / saveModel / loadModel are training & I/O utilities, not part of the
# forward pass, so they are intentionally not translated to Pallas.

if __name__ == "__main__":
    key = jax.random.PRNGKey(0)
    kp, kx = jax.random.split(key)
    params = init_params(kp)

    # Small input consistent with .view(-1, 7*4*4): batch=2, channels=7, 4x4 spatial.
    x_small = jax.random.normal(kx, (2, 7, 4, 4), jnp.float32)
    out_small = jax.block_until_ready(cnn_model_forward(x_small, params))
    ref_small = forward_ref(x_small, params)
    assert out_small.shape == (2, 1), out_small.shape
    assert jnp.allclose(out_small, ref_small, atol=1e-5, rtol=1e-5)

    # Non-aligned, multi-tile batch to exercise the pipelined grid + padding path.
    x_big = jax.random.normal(jax.random.PRNGKey(1), (1029, 7, 4, 4), jnp.float32)
    out_big = jax.block_until_ready(cnn_model_forward(x_big, params))
    ref_big = forward_ref(x_big, params)
    assert out_big.shape == (1029, 1), out_big.shape
    assert jnp.allclose(out_big, ref_big, atol=1e-5, rtol=1e-5)

    print("KERNEL_OK")
</pallas_src>

<mosaic_0001>
module attributes {stable_mosaic.version = 11 : i64} {
  func.func @mlp_kernel(%arg0: i32, %arg1: memref<128x112xf32, #tpu.memory_space<vmem>>, %arg2: memref<112x128xf32, #tpu.memory_space<vmem>>, %arg3: memref<1x128xf32, #tpu.memory_space<vmem>>, %arg4: memref<128x128xf32, #tpu.memory_space<vmem>>, %arg5: memref<1x128xf32, #tpu.memory_space<vmem>>, %arg6: memref<1x128xf32, #tpu.memory_space<vmem>>, %arg7: memref<1x1xf32, #tpu.memory_space<vmem>>, %arg8: memref<1x128xf32, #tpu.memory_space<vmem>>) attributes {dimension_semantics = [#tpu.dimension_semantics<parallel>], iteration_bounds = array<i64: 1>, scalar_prefetch = 0 : i64, scratch_operands = 0 : i64, tpu.core_type = #tpu.core_type<tc>, window_params = [{transform_indices = @transform_0, window_bounds = array<i64: 128, 112>}, {pipeline_mode = #tpu.pipeline_mode<synchronous>, transform_indices = @transform_1, window_bounds = array<i64: 112, 128>}, {pipeline_mode = #tpu.pipeline_mode<synchronous>, transform_indices = @transform_2, window_bounds = array<i64: 1, 128>}, {pipeline_mode = #tpu.pipeline_mode<synchronous>, transform_indices = @transform_3, window_bounds = array<i64: 128, 128>}, {pipeline_mode = #tpu.pipeline_mode<synchronous>, transform_indices = @transform_4, window_bounds = array<i64: 1, 128>}, {pipeline_mode = #tpu.pipeline_mode<synchronous>, transform_indices = @transform_5, window_bounds = array<i64: 1, 128>}, {pipeline_mode = #tpu.pipeline_mode<synchronous>, transform_indices = @transform_6, window_bounds = array<i64: 1, 1>}, {transform_indices = @transform_7, window_bounds = array<i64: 1, 128>}]} {
    %c0 = arith.constant 0 : index
    %c0_0 = arith.constant 0 : index
    %0 = vector.load %arg1[%c0, %c0_0] : memref<128x112xf32, #tpu.memory_space<vmem>>, vector<128x112xf32>
    %c0_1 = arith.constant 0 : index
    %c0_2 = arith.constant 0 : index
    %1 = vector.load %arg2[%c0_1, %c0_2] : memref<112x128xf32, #tpu.memory_space<vmem>>, vector<112x128xf32>
    %cst = arith.constant dense<0.000000e+00> : vector<128x128xf32>
    %2 = tpu.matmul %0, %1, %cst {dimension_numbers = #tpu.dot_dimension_numbers<[1], [0], [0], [1], [0, 0, 1, 1], [], []>} : vector<128x112xf32>, vector<112x128xf32>, vector<128x128xf32> -> vector<128x128xf32>
    %c0_3 = arith.constant 0 : index
    %c0_4 = arith.constant 0 : index
    %3 = vector.load %arg3[%c0_3, %c0_4] : memref<1x128xf32, #tpu.memory_space<vmem>>, vector<1x128xf32>
    %4 = vector.broadcast %3 : vector<1x128xf32> to vector<128x128xf32>
    %5 = arith.addf %2, %4 : vector<128x128xf32>
    %6 = arith.negf %5 : vector<128x128xf32>
    %7 = math.exp %6 : vector<128x128xf32>
    %cst_5 = arith.constant 1.000000e+00 : f32
    %8 = vector.broadcast %cst_5 : f32 to vector<128x128xf32>
    %9 = arith.addf %8, %7 : vector<128x128xf32>
    %10 = arith.divf %8, %9 : vector<128x128xf32>
    %c0_6 = arith.constant 0 : index
    %c0_7 = arith.constant 0 : index
    %11 = vector.load %arg4[%c0_6, %c0_7] : memref<128x128xf32, #tpu.memory_space<vmem>>, vector<128x128xf32>
    %cst_8 = arith.constant dense<0.000000e+00> : vector<128x128xf32>
    %12 = tpu.matmul %10, %11, %cst_8 {dimension_numbers = #tpu.dot_dimension_numbers<[1], [0], [0], [1], [0, 0, 1, 1], [], []>} : vector<128x128xf32>, vector<128x128xf32>, vector<128x128xf32> -> vector<128x128xf32>
    %c0_9 = arith.constant 0 : index
    %c0_10 = arith.constant 0 : index
    %13 = vector.load %arg5[%c0_9, %c0_10] : memref<1x128xf32, #tpu.memory_space<vmem>>, vector<1x128xf32>
    %14 = vector.broadcast %13 : vector<1x128xf32> to vector<128x128xf32>
    %15 = arith.addf %12, %14 : vector<128x128xf32>
    %16 = arith.negf %15 : vector<128x128xf32>
    %17 = math.exp %16 : vector<128x128xf32>
    %cst_11 = arith.constant 1.000000e+00 : f32
    %18 = vector.broadcast %cst_11 : f32 to vector<128x128xf32>
    %19 = arith.addf %18, %17 : vector<128x128xf32>
    %20 = arith.divf %18, %19 : vector<128x128xf32>
    %21 = tpu.transpose %20, [1, 0] : vector<128x128xf32> -> vector<128x128xf32>
    %c0_12 = arith.constant 0 : index
    %c0_13 = arith.constant 0 : index
    %22 = vector.load %arg6[%c0_12, %c0_13] : memref<1x128xf32, #tpu.memory_space<vmem>>, vector<1x128xf32>
    %cst_14 = arith.constant dense<0.000000e+00> : vector<1x128xf32>
    %23 = tpu.matmul %22, %21, %cst_14 {dimension_numbers = #tpu.dot_dimension_numbers<[1], [0], [0], [1], [0, 0, 1, 1], [], []>} : vector<1x128xf32>, vector<128x128xf32>, vector<1x128xf32> -> vector<1x128xf32>
    %c0_15 = arith.constant 0 : index
    %c0_16 = arith.constant 0 : index
    %24 = vector.load %arg7[%c0_15, %c0_16] : memref<1x1xf32, #tpu.memory_space<vmem>>, vector<1x1xf32>
    %25 = vector.broadcast %24 : vector<1x1xf32> to vector<1x128xf32>
    %26 = arith.addf %23, %25 : vector<1x128xf32>
    %27 = arith.negf %26 : vector<1x128xf32>
    %28 = math.exp %27 : vector<1x128xf32>
    %cst_17 = arith.constant 1.000000e+00 : f32
    %29 = vector.broadcast %cst_17 : f32 to vector<1x128xf32>
    %30 = arith.addf %29, %28 : vector<1x128xf32>
    %31 = arith.divf %29, %30 : vector<1x128xf32>
    %c0_18 = arith.constant 0 : index
    %c0_19 = arith.constant 0 : index
    %32 = vector.load %arg8[%c0_18, %c0_19] : memref<1x128xf32, #tpu.memory_space<vmem>>, vector<1x128xf32>
    tpu.vector_store %arg8[%c0_18, %c0_19], %31 {strides = array<i32>} : memref<1x128xf32, #tpu.memory_space<vmem>>, vector<1x128xf32>,
    return
  }
  func.func @transform_0(%arg0: i32) -> (i32, i32) {
    %c0_i32 = arith.constant 0 : i32
    %c0_i32_0 = arith.constant 0 : i32
    return %arg0, %c0_i32 : i32, i32
  }
  func.func @transform_1(%arg0: i32) -> (i32, i32) {
    %c0_i32 = arith.constant 0 : i32
    %c0_i32_0 = arith.constant 0 : i32
    %c0_i32_1 = arith.constant 0 : i32
    return %c0_i32, %c0_i32_0 : i32, i32
  }
  func.func @transform_2(%arg0: i32) -> (i32, i32) {
    %c0_i32 = arith.constant 0 : i32
    %c0_i32_0 = arith.constant 0 : i32
    %c0_i32_1 = arith.constant 0 : i32
    return %c0_i32, %c0_i32_0 : i32, i32
  }
  func.func @transform_3(%arg0: i32) -> (i32, i32) {
    %c0_i32 = arith.constant 0 : i32
    %c0_i32_0 = arith.constant 0 : i32
    %c0_i32_1 = arith.constant 0 : i32
    return %c0_i32, %c0_i32_0 : i32, i32
  }
  func.func @transform_4(%arg0: i32) -> (i32, i32) {
    %c0_i32 = arith.constant 0 : i32
    %c0_i32_0 = arith.constant 0 : i32
    %c0_i32_1 = arith.constant 0 : i32
    return %c0_i32, %c0_i32_0 : i32, i32
  }
  func.func @transform_5(%arg0: i32) -> (i32, i32) {
    %c0_i32 = arith.constant 0 : i32
    %c0_i32_0 = arith.constant 0 : i32
    %c0_i32_1 = arith.constant 0 : i32
    return %c0_i32, %c0_i32_0 : i32, i32
  }
  func.func @transform_6(%arg0: i32) -> (i32, i32) {
    %c0_i32 = arith.constant 0 : i32
    %c0_i32_0 = arith.constant 0 : i32
    %c0_i32_1 = arith.constant 0 : i32
    return %c0_i32, %c0_i32_0 : i32, i32
  }
  func.func @transform_7(%arg0: i32) -> (i32, i32) {
    %c0_i32 = arith.constant 0 : i32
    %c0_i32_0 = arith.constant 0 : i32
    return %c0_i32, %arg0 : i32, i32
  }
}

</mosaic_0001>

<bundles_post_ra>
// kernel: tpu_custom_call.1
= control target key start
LH: loop header
LB: loop body
LE: loop exit
PB: predicated region body
PF: predicated region fallthrough
CT: control target
= control target key end

     0   :  { %s1508_s0 = inlined_call_operand.vmem [shape: f32[128,112], index: 0, kind: input, shape index: {}]   ;;  %s1509_s1 = inlined_call_operand.vmem [shape: f32[112,128], index: 1, kind: input, shape index: {}]   ;;  %s1510_s2 = inlined_call_operand.vmem [shape: f32[1,128], index: 2, kind: input, shape index: {}]   ;;  %s1511_s3 = inlined_call_operand.vmem [shape: f32[128,128], index: 3, kind: input, shape index: {}]   ;;  %s1512_s4 = inlined_call_operand.vmem [shape: f32[1,128], index: 4, kind: input, shape index: {}]   ;;  %s1513_s5 = inlined_call_operand.vmem [shape: f32[1,128], index: 5, kind: input, shape index: {}]   ;;  %s1514_s6 = inlined_call_operand.<no memory space> [shape: f32[1,1], index: 6, kind: input, shape index: {}]   ;;  %s1515_s7 = inlined_call_operand.hbm [shape: f32[1,128], index: 7, kind: output, shape index: {}]  }
   0x1   :  { %v12_v0 = vstv %s1514_s6 }
   0x2   :  { %13 = vst [vmem:[#allocation2] sm:$0x1] %v12_v0 }
   0x3   :  { %v45_v1 = vld [vmem:[%s1509_s1] sm:$0xff]  ;;  %v46_v2 = vld [vmem:[%s1509_s1 + $0x8] sm:$0xff]  ;;  %v47_v3 = vld [vmem:[%s1509_s1 + $0x10] sm:$0xff]  ;;  %vm66_vm0 = vcmask 916480  }
   0x4   :  { %v995_v4 = vpack.c.bf16 %v46_v2, %v45_v1  ;;  %v48_v5 = vld [vmem:[%s1509_s1 + $0x18] sm:$0xff]  ;;  %v49_v7 = vld [vmem:[%s1509_s1 + $0x20] sm:$0xff]  ;;  %v50_v8 = vld [vmem:[%s1509_s1 + $0x28] sm:$0xff] }
   0x5   :  { %v999_v6 = vpack.c.bf16 %v48_v5, %v47_v3  ;;  %v29_v9 = vld [vmem:[%s1508_s0] sm:$0xff]  ;;  %v1003_v10 = vpack.c.bf16 %v50_v8, %v49_v7  ;;  %v51_v11 = vld [vmem:[%s1509_s1 + $0x30] sm:$0xff]  ;;  %v52_v12 = vld [vmem:[%s1509_s1 + $0x38] sm:$0xff] }
   0x6   :  { %996 = vmatprep.subr.bf16.mxu1 %v995_v4  ;;  %880 = vmatprep.mubr.msk.f32.mxu1 %vm66_vm0, %v29_v9  ;;  %v1007_v13 = vpack.c.bf16 %v52_v12, %v51_v11  ;;  %v53_v14 = vld [vmem:[%s1509_s1 + $0x40] sm:$0xff]  ;;  %v54_v15 = vld [vmem:[%s1509_s1 + $0x48] sm:$0xff] }
   0x7   :  { %998 = vmatpush3.bf16.msra.mxu1 %v995_v4 }
   0x8   :  { %1000 = vmatprep.subr.bf16.mxu1 %v999_v6 }
   0xb   :  { %1002 = vmatpush3.bf16.msra.mxu1 %v999_v6 }
   0xc   :  { %1004 = vmatprep.subr.bf16.mxu1 %v1003_v10 }
   0xd   :  { %14 = vsyncpa [#allocation4], 0  ;;  %v1011_v16 = vpack.c.bf16 %v54_v15, %v53_v14  ;;  %v55_v17 = vld [vmem:[%s1509_s1 + $0x50] sm:$0xff]  ;;  %v56_v18 = vld [vmem:[%s1509_s1 + $0x58] sm:$0xff]  ;;  %vm1242_vm1 = vmmov 0   ;;  %s1245_s21 = smov [#allocation3]  }
   0xe   :  { %v1015_v19 = vpack.c.bf16 %v56_v18, %v55_v17  ;;  %v57_v20 = vld [vmem:[%s1509_s1 + $0x60] sm:$0xff]  ;;  %v58_v21 = vld [vmem:[%s1509_s1 + $0x68] sm:$0xff]  ;;  %v31_v27 = vld [vmem:[%s1508_s0 + $0x10] sm:$0xff]  ;;  %s714_s22 = sshll.u32 %s1245_s21, 4  ;;  %s715_s22 = int_to_ptr.vmem [resolvable:$true] %s714_s22 }
   0xf   :  { %1006 = vmatpush3.bf16.msra.mxu1 %v1003_v10  ;;  %v1019_v22 = vpack.c.bf16 %v58_v21, %v57_v20  ;;  %v356_v23 = vld [vmem:[%s1511_s3] sm:$0xff]  ;;  %v357_v24 = vld [vmem:[%s1511_s3 + $0x8] sm:$0xff]  ;;  %v32_v28 = vld [vmem:[%s1508_s0 + $0x18] sm:$0xff]  ;;  %s1221_s23 = scalar_lea.vmem %s715_s22, 32  ;;  %p1222_p1 = scmp.lt.s32.totalorder %s715_s22, %s715_s22 }
  0x10   :  { %1008 = vmatprep.subr.bf16.mxu1 %v1007_v13  ;;  %v1023_v25 = vpack.c.bf16 %v357_v24, %v356_v23  ;;  %v30_v26 = vld [vmem:[%s1508_s0 + $0x8] sm:$0xff]  ;;  %v33_v29 = vld [vmem:[%s1508_s0 + $0x20] sm:$0xff]  ;;  %v35_v31 = vld [vmem:[%s1508_s0 + $0x30] sm:$0xff] }
  0x11   :  { %v34_v30 = vld [vmem:[%s1508_s0 + $0x28] sm:$0xff]  ;;  %v36_v32 = vld [vmem:[%s1508_s0 + $0x38] sm:$0xff]  ;;  %v37_v33 = vld [vmem:[%s1508_s0 + $0x40] sm:$0xff] }
  0x12   :  { %v38_v34 = vld [vmem:[%s1508_s0 + $0x48] sm:$0xff]  ;;  %v39_v35 = vld [vmem:[%s1508_s0 + $0x50] sm:$0xff]  ;;  %v40_v36 = vld [vmem:[%s1508_s0 + $0x58] sm:$0xff] }
  0x13   :  { %1010 = vmatpush3.bf16.msra.mxu1 %v1007_v13  ;;  %v41_v37 = vld [vmem:[%s1508_s0 + $0x60] sm:$0xff]  ;;  %v42_v38 = vld [vmem:[%s1508_s0 + $0x68] sm:$0xff]  ;;  %v43_v39 = vld [vmem:[%s1508_s0 + $0x70] sm:$0xff] }
  0x14   :  { %1012 = vmatprep.subr.bf16.mxu1 %v1011_v16  ;;  %v44_v40 = vld [vmem:[%s1508_s0 + $0x78] sm:$0xff]  ;;  %v358_v41 = vld [vmem:[%s1511_s3 + $0x10] sm:$0xff]  ;;  %v360_v44 = vld [vmem:[%s1511_s3 + $0x20] sm:$0xff] }
  0x15   :  { %v359_v42 = vld [vmem:[%s1511_s3 + $0x18] sm:$0xff]  ;;  %v361_v45 = vld [vmem:[%s1511_s3 + $0x28] sm:$0xff]  ;;  %v362_v47 = vld [vmem:[%s1511_s3 + $0x30] sm:$0xff] }
  0x16   :  { %v1027_v43 = vpack.c.bf16 %v359_v42, %v358_v41  ;;  %v1031_v46 = vpack.c.bf16 %v361_v45, %v360_v44  ;;  %v363_v48 = vld [vmem:[%s1511_s3 + $0x38] sm:$0xff]  ;;  %v364_v50 = vld [vmem:[%s1511_s3 + $0x40] sm:$0xff]  ;;  %v365_v51 = vld [vmem:[%s1511_s3 + $0x48] sm:$0xff] }
  0x17   :  { %1014 = vmatpush3.bf16.msra.mxu1 %v1011_v16  ;;  %v1035_v49 = vpack.c.bf16 %v363_v48, %v362_v47  ;;  %v1039_v52 = vpack.c.bf16 %v365_v51, %v364_v50  ;;  %v366_v53 = vld [vmem:[%s1511_s3 + $0x50] sm:$0xff]  ;;  %v367_v54 = vld [vmem:[%s1511_s3 + $0x58] sm:$0xff]  ;;  %v368_v56 = vld [vmem:[%s1511_s3 + $0x60] sm:$0xff] }
  0x18   :  { %1016 = vmatprep.subr.bf16.mxu1 %v1015_v19  ;;  %v1043_v55 = vpack.c.bf16 %v367_v54, %v366_v53  ;;  %v369_v57 = vld [vmem:[%s1511_s3 + $0x68] sm:$0xff]  ;;  %v370_v59 = vld [vmem:[%s1511_s3 + $0x70] sm:$0xff]  ;;  %v371_v60 = vld [vmem:[%s1511_s3 + $0x78] sm:$0xff] }
  0x19   :  { %v1047_v58 = vpack.c.bf16 %v369_v57, %v368_v56  ;;  %v1051_v61 = vpack.c.bf16 %v371_v60, %v370_v59  ;;  %v1446_v62 = vld [vmem:[%s1510_s2] ss:$0 sm:$0xff] }
  0x1b   :  { %1018 = vmatpush3.bf16.msra.mxu1 %v1015_v19 }
  0x1c   :  { %1020 = vmatprep.subr.bf16.mxu1 %v1019_v22 }
  0x1f   :  { %1022 = vmatpush3.bf16.msra.mxu1 %v1019_v22 }
  0x20   :  { %1024 = vmatprep.subr.bf16.mxu1 %v1023_v25 }
  0x22   :  { %881 = vmatmul.mubr.msk.f32.vlgmr.msra.gmra.mrb[0].mxu1 %vm66_vm0, %v30_v26 }
  0x23   :  { %883 = vmatprep.mubr.msk.f32.mxu1 %vm66_vm0, %v31_v27  ;;  %1026 = vmatpush3.bf16.msra.mxu1 %v1023_v25 }
  0x24   :  { %1028 = vmatprep.subr.bf16.mxu1 %v1027_v43 }
  0x26   :  { %884 = vmatmul.mubr.msk.f32.gmra.mrb[2].mxu1 %vm66_vm0, %v32_v28 }
  0x27   :  { %886 = vmatprep.mubr.msk.f32.mxu1 %vm66_vm0, %v33_v29  ;;  %1030 = vmatpush3.bf16.msra.mxu1 %v1027_v43 }
  0x28   :  { %1032 = vmatprep.subr.bf16.mxu1 %v1031_v46 }
  0x2a   :  { %887 = vmatmul.mubr.msk.f32.gmra.mrb[4].mxu1 %vm66_vm0, %v34_v30 }
  0x2b   :  { %889 = vmatprep.mubr.msk.f32.mxu1 %vm66_vm0, %v35_v31  ;;  %1034 = vmatpush3.bf16.msra.mxu1 %v1031_v46 }
  0x2c   :  { %1036 = vmatprep.subr.bf16.mxu1 %v1035_v49 }
  0x2e   :  { %890 = vmatmul.mubr.msk.f32.gmra.mrb[6].mxu1 %vm66_vm0, %v36_v32 }
  0x2f   :  { %892 = vmatprep.mubr.msk.f32.mxu1 %vm66_vm0, %v37_v33  ;;  %1038 = vmatpush3.bf16.msra.mxu1 %v1035_v49 }
  0x30   :  { %1040 = vmatprep.subr.bf16.mxu1 %v1039_v52 }
  0x32   :  { %893 = vmatmul.mubr.msk.f32.gmra.mrb[8].mxu1 %vm66_vm0, %v38_v34 }
  0x33   :  { %895 = vmatprep.mubr.msk.f32.mxu1 %vm66_vm0, %v39_v35  ;;  %1042 = vmatpush3.bf16.msra.mxu1 %v1039_v52 }
  0x34   :  { %1044 = vmatprep.subr.bf16.mxu1 %v1043_v55 }
  0x36   :  { %896 = vmatmul.mubr.msk.f32.gmra.mrb[10].mxu1 %vm66_vm0, %v40_v36 }
  0x37   :  { %898 = vmatprep.mubr.msk.f32.mxu1 %vm66_vm0, %v41_v37  ;;  %1046 = vmatpush3.bf16.msra.mxu1 %v1043_v55 }
  0x38   :  { %1048 = vmatprep.subr.bf16.mxu1 %v1047_v58 }
  0x3a   :  { %899 = vmatmul.mubr.msk.f32.gmra.mrb[12].mxu1 %vm66_vm0, %v42_v38 }
  0x3b   :  { %901 = vmatprep.mubr.msk.f32.mxu1 %vm66_vm0, %v43_v39  ;;  %1050 = vmatpush3.bf16.msra.mxu1 %v1047_v58 }
  0x3c   :  { %1052 = vmatprep.subr.bf16.mxu1 %v1051_v61 }
  0x3e   :  { %902 = vmatmul.mubr.msk.f32.gmra.mrb[14].mxu1 %vm66_vm0, %v44_v40 }
  0x3f   :  { %1054 = vmatpush3.bf16.msra.mxu1 %v1051_v61 }
  0xf5   :  { %v882_v63 = vpop.f32.mrb[0].mxu1 }
  0xf6   :  { %v187_v0 = vadd.f32 %v882_v63, %v1446_v62  ;;  %v181_v1 = vpop.f32.mrb[1].mxu1 }
  0xf7   :  { %v182_v2 = vadd.f32 %v1446_v62, %v181_v1 }
  0xf8   :  { %v740_v3 = vmul.f32 -1.442695, %v187_v0 }
  0xf9   :  { %v739_v4 = vmul.f32 -1.442695, %v182_v2  ;;  %v885_v5 = vpop.f32.mrb[2].mxu1 }
  0xfa   :  { %1085 = vpow2.f32 %v740_v3  ;;  %v197_v6 = vadd.f32 %v885_v5, %v1446_v62  ;;  %v191_v7 = vpop.f32.mrb[3].mxu1 }
  0xfb   :  { %1087 = vpow2.f32 %v739_v4  ;;  %v192_v8 = vadd.f32 %v1446_v62, %v191_v7 }
  0xfc   :  { %v742_v9 = vmul.f32 -1.442695, %v197_v6 }
  0xfd   :  { %v741_v10 = vmul.f32 -1.442695, %v192_v8  ;;  %v888_v11 = vpop.f32.mrb[4].mxu1 }
  0xfe   :  { %1089 = vpow2.f32 %v742_v9  ;;  %v207_v12 = vadd.f32 %v888_v11, %v1446_v62  ;;  %v201_v13 = vpop.f32.mrb[5].mxu1 }
  0xff   :  { %1091 = vpow2.f32 %v741_v10  ;;  %v202_v14 = vadd.f32 %v1446_v62, %v201_v13 }
 0x100   :  { %v744_v15 = vmul.f32 -1.442695, %v207_v12 }
 0x101   :  { %v743_v16 = vmul.f32 -1.442695, %v202_v14  ;;  %v891_v17 = vpop.f32.mrb[6].mxu1 }
 0x102   :  { %1093 = vpow2.f32 %v744_v15  ;;  %v217_v18 = vadd.f32 %v891_v17, %v1446_v62  ;;  %v211_v19 = vpop.f32.mrb[7].mxu1 }
 0x103   :  { %1095 = vpow2.f32 %v743_v16  ;;  %v212_v20 = vadd.f32 %v1446_v62, %v211_v19 }
 0x104   :  { %v1086_v21 = vpop.eup %1085  ;;  %v746_v22 = vmul.f32 -1.442695, %v217_v18 }
 0x105   :  { %v1088_v23 = vpop.eup %1087  ;;  %v309_v24 = vadd.f32 1.0, %v1086_v21  ;;  %v745_v25 = vmul.f32 -1.442695, %v212_v20  ;;  %v894_v26 = vpop.f32.mrb[8].mxu1 }
 0x106   :  { %v308_v27 = vadd.f32 1.0, %v1088_v23  ;;  %1097 = vpow2.f32 %v746_v22  ;;  %v227_v28 = vadd.f32 %v894_v26, %v1446_v62  ;;  %v221_v29 = vpop.f32.mrb[9].mxu1 }
 0x107   :  { %1099 = vrcp.f32 %v309_v24  ;;  %v222_v30 = vadd.f32 %v1446_v62, %v221_v29 }
 0x108   :  { %v1090_v31 = vpop.eup %1089  ;;  %1101 = vrcp.f32 %v308_v27  ;;  %v748_v32 = vmul.f32 -1.442695, %v227_v28 }
 0x109   :  { %v1092_v33 = vpop.eup %1091  ;;  %v311_v34 = vadd.f32 1.0, %v1090_v31  ;;  %1103 = vpow2.f32 %v745_v25  ;;  %v747_v35 = vmul.f32 -1.442695, %v222_v30  ;;  %v897_v36 = vpop.f32.mrb[10].mxu1  ;;  %v1241_v31 = vmov 0.0|0.0  }
 0x10a   :  { %v310_v37 = vadd.f32 1.0, %v1092_v33  ;;  %1105 = vpow2.f32 %v748_v32  ;;  %v237_v38 = vadd.f32 %v897_v36, %v1446_v62  ;;  %v231_v39 = vpop.f32.mrb[11].mxu1  ;;  %1055 = vmatprep.subr.bf16.mxu0 %v1241_v31  ;;  %v1243_v32 = vmov 0.0   ;;  %v621_v33 = vld [vmem:[#allocation2] sm:$0x1] }
 0x10b   :  { %1107 = vrcp.f32 %v311_v34  ;;  %v232_v40 = vadd.f32 %v1446_v62, %v231_v39  ;;  %992 = vmatprep.mubr.msk.f32.mxu0 %vm1242_vm1, %v1243_v32  ;;  %v1244_v34 = vmov 0  }
 0x10c   :  { %v1094_v41 = vpop.eup %1093  ;;  %1109 = vrcp.f32 %v310_v37  ;;  %v750_v42 = vmul.f32 -1.442695, %v237_v38  ;;  %1084 = vset.pattern.permute.xlu0 %v1244_v34 }
 0x10d   :  { %v1096_v43 = vpop.eup %1095  ;;  %v313_v44 = vadd.f32 1.0, %v1094_v41  ;;  %1111 = vpow2.f32 %v747_v35  ;;  %v749_v45 = vmul.f32 -1.442695, %v232_v40  ;;  %v900_v46 = vpop.f32.mrb[12].mxu1  ;;  %624 = vperm.xlu0 %1084, %v621_v33   ;;  %v1468_v35 = vld [vmem:[%s1512_s4] ss:$0 sm:$0xff] }
 0x10e   :  { %v312_v47 = vadd.f32 1.0, %v1096_v43  ;;  %1113 = vpow2.f32 %v750_v42  ;;  %v247_v48 = vadd.f32 %v900_v46, %v1446_v62  ;;  %v241_v49 = vpop.f32.mrb[13].mxu1 }
 0x10f   :  { %1115 = vrcp.f32 %v313_v44  ;;  %v242_v50 = vadd.f32 %v1446_v62, %v241_v49 }
 0x110   :  { %v1098_v51 = vpop.eup %1097  ;;  %1117 = vrcp.f32 %v312_v47  ;;  %v752_v52 = vmul.f32 -1.442695, %v247_v48 }
 0x111   :  { %v1100_v53 = vpop.eup %1099  ;;  %v315_v54 = vadd.f32 1.0, %v1098_v51  ;;  %1119 = vpow2.f32 %v749_v45  ;;  %v751_v55 = vmul.f32 -1.442695, %v242_v50  ;;  %v903_v56 = vpop.f32.mrb[14].mxu1 }
 0x112   :  { %v1102_v57 = vpop.eup %1101  ;;  %1121 = vpow2.f32 %v752_v52  ;;  %v257_v58 = vadd.f32 %v903_v56, %v1446_v62  ;;  %v251_v59 = vpop.f32.mrb[15].mxu1 }
 0x113   :  { %v1104_v60 = vpop.eup %1103  ;;  %936 = vmatprep.mubr.f32.mxu1 %v1102_v57  ;;  %v252_v61 = vadd.f32 %v1446_v62, %v251_v59  ;;  %1123 = vpow2.f32 %v751_v55 }
 0x114   :  { %v1106_v63 = vpop.eup %1105  ;;  %v314_v0 = vadd.f32 1.0, %v1104_v60  ;;  %937 = vmatmul.mubr.f32.vlgmr.msra.gmra.mrb[16].mxu1 %v1100_v53  ;;  %v754_v1 = vmul.f32 -1.442695, %v257_v58  ;;  %1125 = vrcp.f32 %v315_v54 }
 0x115   :  { %v1108_v2 = vpop.eup %1107  ;;  %v317_v3 = vadd.f32 1.0, %v1106_v63  ;;  %v753_v4 = vmul.f32 -1.442695, %v252_v61 }
 0x116   :  { %v1110_v5 = vpop.eup %1109  ;;  %1127 = vrcp.f32 %v314_v0 }
 0x117   :  { %v1112_v6 = vpop.eup %1111  ;;  %1129 = vrcp.f32 %v317_v3  ;;  %939 = vmatprep.mubr.f32.mxu1 %v1110_v5 }
 0x118   :  { %v1114_v7 = vpop.eup %1113  ;;  %v316_v8 = vadd.f32 1.0, %v1112_v6  ;;  %940 = vmatmul.mubr.f32.gmra.mrb[18].mxu1 %v1108_v2  ;;  %1131 = vpow2.f32 %v754_v1 }
 0x119   :  { %v1116_v9 = vpop.eup %1115  ;;  %v319_v62 = vadd.f32 1.0, %v1114_v7  ;;  %1133 = vpow2.f32 %v753_v4 }
 0x11a   :  { %v1118_v10 = vpop.eup %1117  ;;  %1135 = vrcp.f32 %v316_v8 }
 0x11b   :  { %v1120_v11 = vpop.eup %1119  ;;  %942 = vmatprep.mubr.f32.mxu1 %v1118_v10  ;;  %1137 = vrcp.f32 %v319_v62 }
 0x11c   :  { %v1122_v12 = vpop.eup %1121  ;;  %v318_v13 = vadd.f32 1.0, %v1120_v11  ;;  %943 = vmatmul.mubr.f32.gmra.mrb[20].mxu1 %v1116_v9 }
 0x11d   :  { %v321_v14 = vadd.f32 1.0, %v1122_v12  ;;  %v1124_v15 = vpop.eup %1123 }
 0x11e   :  { %1139 = vrcp.f32 %v318_v13  ;;  %v1126_v16 = vpop.eup %1125  ;;  %v320_v17 = vadd.f32 1.0, %v1124_v15 }
 0x11f   :  { %1141 = vrcp.f32 %v321_v14 }
 0x120   :  { %v1128_v18 = vpop.eup %1127  ;;  %1143 = vrcp.f32 %v320_v17 }
 0x121   :  { %v1130_v19 = vpop.eup %1129  ;;  %945 = vmatprep.mubr.f32.mxu1 %v1128_v18 }
 0x122   :  { %v1132_v20 = vpop.eup %1131  ;;  %946 = vmatmul.mubr.f32.gmra.mrb[22].mxu1 %v1126_v16 }
 0x123   :  { %v1134_v21 = vpop.eup %1133  ;;  %v323_v22 = vadd.f32 1.0, %v1132_v20 }
 0x124   :  { %v1136_v23 = vpop.eup %1135  ;;  %v322_v24 = vadd.f32 1.0, %v1134_v21 }
 0x125   :  { %1145 = vrcp.f32 %v323_v22  ;;  %948 = vmatprep.mubr.f32.mxu1 %v1136_v23  ;;  %v1138_v25 = vpop.eup %1137 }
 0x126   :  { %1147 = vrcp.f32 %v322_v24  ;;  %949 = vmatmul.mubr.f32.gmra.mrb[24].mxu1 %v1130_v19 }
 0x128   :  { %v1140_v26 = vpop.eup %1139 }
 0x129   :  { %951 = vmatprep.mubr.f32.mxu1 %v1140_v26  ;;  %v1142_v27 = vpop.eup %1141 }
 0x12a   :  { %952 = vmatmul.mubr.f32.gmra.mrb[26].mxu1 %v1138_v25  ;;  %v1144_v28 = vpop.eup %1143 }
 0x12b   :  { %954 = vmatprep.mubr.f32.mxu1 %v1144_v28 }
 0x12e   :  { %955 = vmatmul.mubr.f32.gmra.mrb[28].mxu1 %v1142_v27 }
 0x12f   :  { %v1146_v29 = vpop.eup %1145 }
 0x130   :  { %v1148_v30 = vpop.eup %1147 }
 0x131   :  { %957 = vmatprep.mubr.f32.mxu1 %v1148_v30 }
 0x132   :  { %958 = vmatmul.mubr.f32.gmra.mrb[30].mxu1 %v1146_v29 }
 0x1e7   :  { %v938_v36 = vpop.f32.mrb[16].mxu1 }
 0x1e8   :  { %v451_v37 = vadd.f32 %v938_v36, %v1468_v35  ;;  %v445_v38 = vpop.f32.mrb[17].mxu1 }
 0x1e9   :  { %v446_v39 = vadd.f32 %v1468_v35, %v445_v38 }
 0x1ea   :  { %v757_v40 = vmul.f32 -1.442695, %v451_v37 }
 0x1eb   :  { %v756_v41 = vmul.f32 -1.442695, %v446_v39  ;;  %v941_v42 = vpop.f32.mrb[18].mxu1 }
 0x1ec   :  { %1149 = vpow2.f32 %v757_v40  ;;  %v461_v43 = vadd.f32 %v941_v42, %v1468_v35  ;;  %v455_v44 = vpop.f32.mrb[19].mxu1 }
 0x1ed   :  { %1151 = vpow2.f32 %v756_v41  ;;  %v456_v45 = vadd.f32 %v1468_v35, %v455_v44 }
 0x1ee   :  { %v759_v46 = vmul.f32 -1.442695, %v461_v43 }
 0x1ef   :  { %v758_v47 = vmul.f32 -1.442695, %v456_v45  ;;  %v944_v48 = vpop.f32.mrb[20].mxu1 }
 0x1f0   :  { %1153 = vpow2.f32 %v759_v46  ;;  %v471_v49 = vadd.f32 %v944_v48, %v1468_v35  ;;  %v465_v50 = vpop.f32.mrb[21].mxu1 }
 0x1f1   :  { %1155 = vpow2.f32 %v758_v47  ;;  %v466_v51 = vadd.f32 %v1468_v35, %v465_v50 }
 0x1f2   :  { %v761_v52 = vmul.f32 -1.442695, %v471_v49 }
 0x1f3   :  { %v760_v53 = vmul.f32 -1.442695, %v466_v51 }
 0x1f4   :  { %1157 = vpow2.f32 %v761_v52 }
 0x1f5   :  { %1159 = vpow2.f32 %v760_v53  ;;  %v947_v54 = vpop.f32.mrb[22].mxu1 }
 0x1f6   :  { %v1150_v55 = vpop.eup %1149  ;;  %v481_v56 = vadd.f32 %v947_v54, %v1468_v35  ;;  %v475_v57 = vpop.f32.mrb[23].mxu1 }
 0x1f7   :  { %v1152_v58 = vpop.eup %1151  ;;  %v573_v59 = vadd.f32 1.0, %v1150_v55  ;;  %v476_v60 = vadd.f32 %v1468_v35, %v475_v57 }
 0x1f8   :  { %v572_v61 = vadd.f32 1.0, %v1152_v58  ;;  %v763_v63 = vmul.f32 -1.442695, %v481_v56 }
 0x1f9   :  { %1161 = vrcp.f32 %v573_v59  ;;  %v762_v0 = vmul.f32 -1.442695, %v476_v60  ;;  %v950_v1 = vpop.f32.mrb[24].mxu1 }
 0x1fa   :  { %v1154_v2 = vpop.eup %1153  ;;  %1163 = vrcp.f32 %v572_v61  ;;  %v491_v3 = vadd.f32 %v950_v1, %v1468_v35  ;;  %v485_v4 = vpop.f32.mrb[25].mxu1 }
 0x1fb   :  { %v1156_v5 = vpop.eup %1155  ;;  %v575_v6 = vadd.f32 1.0, %v1154_v2  ;;  %1165 = vpow2.f32 %v763_v63  ;;  %v486_v7 = vadd.f32 %v1468_v35, %v485_v4 }
 0x1fc   :  { %v574_v8 = vadd.f32 1.0, %v1156_v5  ;;  %1167 = vpow2.f32 %v762_v0  ;;  %v765_v9 = vmul.f32 -1.442695, %v491_v3 }
 0x1fd   :  { %1169 = vrcp.f32 %v575_v6  ;;  %v764_v62 = vmul.f32 -1.442695, %v486_v7  ;;  %v953_v10 = vpop.f32.mrb[26].mxu1 }
 0x1fe   :  { %v1158_v11 = vpop.eup %1157  ;;  %1171 = vrcp.f32 %v574_v8  ;;  %v501_v12 = vadd.f32 %v953_v10, %v1468_v35  ;;  %v495_v13 = vpop.f32.mrb[27].mxu1 }
 0x1ff   :  { %v1160_v14 = vpop.eup %1159  ;;  %v577_v15 = vadd.f32 1.0, %v1158_v11  ;;  %1173 = vpow2.f32 %v765_v9  ;;  %v496_v16 = vadd.f32 %v1468_v35, %v495_v13  ;;  %v620_v13 = vld [vmem:[%s1513_s5] sm:$0x1]  ;;  %s1217_s5 = scalar_lea.vmem %s715_s22, 16 }
 0x200   :  { %v576_v17 = vadd.f32 1.0, %v1160_v14  ;;  %1175 = vpow2.f32 %v764_v62  ;;  %v767_v18 = vmul.f32 -1.442695, %v501_v12  ;;  %v627_v14 = vlaneseq  ;;  %p1218_p0 = scmp.ne.s32.totalorder %s715_s22, %s1217_s5  ;;  %p1223_p2 = scmp.lt.s32.totalorder %s1221_s23, %s1217_s5 }
 0x201   :  { %1177 = vrcp.f32 %v577_v15  ;;  %v766_v19 = vmul.f32 -1.442695, %v496_v16  ;;  %v956_v20 = vpop.f32.mrb[28].mxu1 }
 0x202   :  { %1179 = vrcp.f32 %v576_v17  ;;  %v511_v21 = vadd.f32 %v956_v20, %v1468_v35  ;;  %v505_v22 = vpop.f32.mrb[29].mxu1  ;;  %v628_v15 = vshrl.u32 %v627_v14, 7  ;;  %v625_v17 = vpop.permute.xlu0 %624  ;;  %p1224_p3 = por %p1223_p2, %p1222_p1 }
 0x203   :  { %v1162_v23 = vpop.eup %1161  ;;  %1181 = vpow2.f32 %v767_v18  ;;  %v506_v24 = vadd.f32 %v1468_v35, %v505_v22 }
 0x204   :  { %v1164_v25 = vpop.eup %1163  ;;  %1183 = vpow2.f32 %v766_v19  ;;  %v769_v26 = vmul.f32 -1.442695, %v511_v21  ;;  %v629_v16 = vsub.s32 0, %v628_v15  ;;  %p1225_p4 = pnand %p1224_p3, %p1218_p0 }
 0x205   :  { %v1166_v27 = vpop.eup %1165  ;;  %v1056_v28 = vpack.c.bf16 %v1162_v23, %v1164_v25  ;;  %v768_v29 = vmul.f32 -1.442695, %v506_v24  ;;  %v959_v30 = vpop.f32.mrb[30].mxu1 }
 0x206   :  { %v1168_v32 = vpop.eup %1167  ;;  %v579_v33 = vadd.f32 1.0, %v1166_v27  ;;  %1185 = vpow2.f32 %v769_v26  ;;  %v521_v34 = vadd.f32 %v959_v30, %v1468_v35  ;;  %v515_v36 = vpop.f32.mrb[31].mxu1  ;;  %v630_v18 = vrot.slane %v625_v17, %v629_v16 }
 0x207   :  { %v1170_v37 = vpop.eup %1169  ;;  %v578_v38 = vadd.f32 1.0, %v1168_v32  ;;  %1057 = vmatpush3.bf16.xpose.msra.mxu0 %v1056_v28  ;;  %1187 = vpow2.f32 %v768_v29  ;;  %v516_v39 = vadd.f32 %v1468_v35, %v515_v36 }
 0x208   :  { %v1172_v40 = vpop.eup %1171  ;;  %1189 = vrcp.f32 %v579_v33  ;;  %1058 = vmatprep.subr.bf16.mxu0 %v1241_v31  ;;  %v771_v41 = vmul.f32 -1.442695, %v521_v34 }
 0x209   :  { %v1174_v42 = vpop.eup %1173  ;;  %1191 = vrcp.f32 %v578_v38  ;;  %v1059_v43 = vpack.c.bf16 %v1170_v37, %v1172_v40  ;;  %v770_v44 = vmul.f32 -1.442695, %v516_v39 }
 0x20a   :  { %v1176_v45 = vpop.eup %1175  ;;  %v581_v46 = vadd.f32 1.0, %v1174_v42  ;;  %1193 = vpow2.f32 %v771_v41 }
 0x20b   :  { %v1178_v47 = vpop.eup %1177  ;;  %v580_v48 = vadd.f32 1.0, %v1176_v45  ;;  %1195 = vpow2.f32 %v770_v44 }
 0x20c   :  { %v1180_v49 = vpop.eup %1179  ;;  %1197 = vrcp.f32 %v581_v46 }
 0x20d   :  { %v1182_v50 = vpop.eup %1181  ;;  %1199 = vrcp.f32 %v580_v48  ;;  %v1062_v35 = vpack.c.bf16 %v1178_v47, %v1180_v49 }
 0x20e   :  { %v1184_v51 = vpop.eup %1183  ;;  %v583_v52 = vadd.f32 1.0, %v1182_v50 }
 0x20f   :  { %v582_v53 = vadd.f32 1.0, %v1184_v51  ;;  %1060 = vmatpush3.bf16.xpose.msra.mxu0 %v1059_v43 }
 0x210   :  { %v1186_v54 = vpop.eup %1185  ;;  %1201 = vrcp.f32 %v583_v52  ;;  %1061 = vmatprep.subr.bf16.mxu0 %v1241_v31 }
 0x211   :  { %v1188_v55 = vpop.eup %1187  ;;  %1203 = vrcp.f32 %v582_v53  ;;  %v585_v56 = vadd.f32 1.0, %v1186_v54 }
 0x212   :  { %v1190_v57 = vpop.eup %1189  ;;  %v584_v58 = vadd.f32 1.0, %v1188_v55 }
 0x213   :  { %v1192_v59 = vpop.eup %1191  ;;  %1205 = vrcp.f32 %v585_v56 }
 0x214   :  { %v1194_v60 = vpop.eup %1193  ;;  %1207 = vrcp.f32 %v584_v58  ;;  %v1065_v61 = vpack.c.bf16 %v1190_v57, %v1192_v59 }
 0x215   :  { %v1196_v63 = vpop.eup %1195  ;;  %v587_v0 = vadd.f32 1.0, %v1194_v60 }
 0x216   :  { %v1198_v1 = vpop.eup %1197  ;;  %v586_v2 = vadd.f32 1.0, %v1196_v63 }
 0x217   :  { %v1200_v3 = vpop.eup %1199  ;;  %1063 = vmatpush3.bf16.xpose.msra.mxu0 %v1062_v35  ;;  %1209 = vrcp.f32 %v587_v0 }
 0x218   :  { %1211 = vrcp.f32 %v586_v2  ;;  %1064 = vmatprep.subr.bf16.mxu0 %v1241_v31  ;;  %v1068_v4 = vpack.c.bf16 %v1198_v1, %v1200_v3 }
 0x21a   :  { %v1202_v5 = vpop.eup %1201 }
 0x21b   :  { %v1204_v6 = vpop.eup %1203 }
 0x21c   :  { %v1071_v7 = vpack.c.bf16 %v1202_v5, %v1204_v6 }
 0x21d   :  { %v1206_v8 = vpop.eup %1205 }
 0x21e   :  { %v1208_v9 = vpop.eup %1207 }
 0x21f   :  { %1066 = vmatpush3.bf16.xpose.msra.mxu0 %v1065_v61  ;;  %v1074_v62 = vpack.c.bf16 %v1206_v8, %v1208_v9 }
 0x220   :  { %1067 = vmatprep.subr.bf16.mxu0 %v1241_v31 }
 0x221   :  { %v1210_v10 = vpop.eup %1209 }
 0x222   :  { %v1212_v11 = vpop.eup %1211 }
 0x223   :  { %v1077_v12 = vpack.c.bf16 %v1210_v10, %v1212_v11 }
 0x227   :  { %1069 = vmatpush3.bf16.xpose.msra.mxu0 %v1068_v4 }
 0x228   :  { %1070 = vmatprep.subr.bf16.mxu0 %v1241_v31 }
 0x22f   :  { %1072 = vmatpush3.bf16.xpose.msra.mxu0 %v1071_v7 }
 0x230   :  { %1073 = vmatprep.subr.bf16.mxu0 %v1241_v31 }
 0x237   :  { %1075 = vmatpush3.bf16.xpose.msra.mxu0 %v1074_v62 }
 0x238   :  { %1076 = vmatprep.subr.bf16.mxu0 %v1241_v31 }
 0x23f   :  { %1078 = vmatpush3.bf16.xpose.msra.mxu0 %v1077_v12 }
 0x246   :  { %993 = vmatmul.mubr.f32.vlgmr.msra.gmra.mrb[0].mxu0 %v620_v13 }
 0x319   :  { %v697_v19 = vpop.f32.mrb[0].mxu0 }
 0x31a   :  { %v698_v20 = vadd.f32 %v697_v19, %v630_v18  ;;  %v994_v21 = vpop.f32.mrb[1].mxu0 }
 0x31c   :  { %v772_v22 = vmul.f32 -1.442695, %v698_v20 }
 0x31e   :  { %1213 = vpow2.f32 %v772_v22 }
 0x328   :  { %v1214_v23 = vpop.eup %1213 }
 0x329   :  { %v704_v24 = vadd.f32 1.0, %v1214_v23 }
 0x32b   :  { %1215 = vrcp.f32 %v704_v24 }
 0x335   :  { %v1216_v31 = vpop.eup %1215 }
 0x336   :  { %707 = vst [vmem:[#allocation3] sm:$0x1] %v1216_v31 }
 0x337   :  { %1228 = shalt.err (!%p1225_p4)
}
 0x338   :  { %s1229_s25 = scalar_lea.hbm %s1515_s7, 16 }
 0x339   :  { %p1230_p5 = scmp.ne.s32.totalorder %s1515_s7, %s1229_s25  ;;  %p1233_p6 = scmp.lt.u32.totalorder %s1229_s25, %s1515_s7 }
 0x33b   :  { %p1235_p7 = pnand %p1233_p6, %p1230_p5 }
 0x33d   :  { %1238 = shalt.err (!%p1235_p7)
}
 0x33e   :  { %717 = dma.vmem_to_hbm [thread:$0]  %s715_s22, 16, %s1515_s7, [#allocation4]  }
 0x33f   :  { %1239 = dma.done.wait [#allocation4], 16  }
 0x340   :  { %1240 = vsyncadd [#allocation4], 4294967280 }
 0x341   :  { %721 = vsyncpa [#allocation4], 1 }

</bundles_post_ra>
